<compile_context>
chip_gen: v7x
topology: tpu7x:2x2x1
jax: 0.10.0
libtpu: 0.0.40
codegen_flags: <defaults>
</compile_context>

<pallas_src>
import functools
import math

import jax
import jax.numpy as jnp
from jax import lax
from jax.experimental import pallas as pl
from jax.experimental.pallas import tpu as pltpu


# Finite sentinel for masked scores: robust against fully-masked rows
# (exp(-inf - (-inf)) = NaN with a true -inf fill).
_NEG_INF = -1e30


# ---------------------------------------------------------------------------
# Kernel bodies
# ---------------------------------------------------------------------------
def _scores(q, k, mask, scale):
    """q:(G,tq,D)  k:(G,Skv,D)  mask:(Gm,tq,Skv) int8 or None -> (G,tq,Skv) f32."""
    # Fold 1/sqrt(d_k) into the small q tile (G*tq*D multiplies instead of
    # G*tq*Skv on the score tile).
    q = q * jnp.asarray(scale, q.dtype)
    s = lax.dot_general(q, k, (((2,), (2,)), ((0,), (0,))),
                        preferred_element_type=jnp.float32)
    if mask is not None:
        s = jnp.where(mask != 0, s, _NEG_INF)
    return s


def _store_out(o_ref, out, lane_dense):
    """out: (G, tq, Dv) f32 -> output ref (lane-dense (tq, G*Dv) if requested)."""
    if lane_dense:
        g = out.shape[0]
        slab = jnp.concatenate([out[i] for i in range(g)], axis=-1)  # (tq, G*Dv)
        o_ref[0, 0] = slab.astype(o_ref.dtype)
    else:
        o_ref[0] = out.astype(o_ref.dtype)


def _weights_body(q, k, v, mask, scale, lane_dense, o_ref, w_ref):
    s = _scores(q, k, mask, scale)
    m = jnp.max(s, axis=-1, keepdims=True)
    e = jnp.exp(s - m)
    w = e / jnp.sum(e, axis=-1, keepdims=True)          # exact: user-visible weights
    out = lax.dot_general(w.astype(v.dtype), v,          # PV in native dtype
                          (((2,), (1,)), ((0,), (0,))),
                          preferred_element_type=jnp.float32)
    _store_out(o_ref, out, lane_dense)
    w_ref[0] = w.astype(w_ref.dtype)


def _weights_kernel(q_ref, k_ref, v_ref, o_ref, w_ref, *, scale, lane_dense):
    _weights_body(q_ref[0], k_ref[0], v_ref[0], None, scale, lane_dense,
                  o_ref, w_ref)


def _weights_masked_kernel(q_ref, k_ref, v_ref, m_ref, o_ref, w_ref, *,
                           scale, lane_dense):
    _weights_body(q_ref[0], k_ref[0], v_ref[0], m_ref[0], scale, lane_dense,
                  o_ref, w_ref)


def _flash_body(q, k, v, mask, scale, lane_dense, o_ref, m_sc, l_sc, acc_sc):
    kv_step = pl.program_id(3)

    @pl.when(kv_step == 0)
    def _init():
        m_sc[...] = jnp.full(m_sc.shape, -jnp.inf, m_sc.dtype)
        l_sc[...] = jnp.zeros(l_sc.shape, l_sc.dtype)
        acc_sc[...] = jnp.zeros(acc_sc.shape, acc_sc.dtype)

    s = _scores(q, k, mask, scale)                      # (G, tq, tkv) f32
    m_prev = m_sc[...]
    m_new = jnp.maximum(m_prev, jnp.max(s, axis=-1, keepdims=True))
    alpha = jnp.exp(m_prev - m_new)
    p = jnp.exp(s - m_new)
    l_sc[...] = alpha * l_sc[...] + jnp.sum(p, axis=-1, keepdims=True)
    acc_sc[...] = alpha * acc_sc[...] + lax.dot_general(
        p.astype(v.dtype), v, (((2,), (1,)), ((0,), (0,))),
        preferred_element_type=jnp.float32)
    m_sc[...] = m_new

    @pl.when(kv_step == pl.num_programs(3) - 1)
    def _finalize():
        out = acc_sc[...] * pl.reciprocal(l_sc[...], approx=True)
        _store_out(o_ref, out, lane_dense)


def _flash_kernel(q_ref, k_ref, v_ref, o_ref, m_sc, l_sc, acc_sc, *,
                  scale, lane_dense):
    _flash_body(q_ref[0], k_ref[0], v_ref[0], None, scale, lane_dense,
                o_ref, m_sc, l_sc, acc_sc)


def _flash_masked_kernel(q_ref, k_ref, v_ref, mask_ref, o_ref,
                         m_sc, l_sc, acc_sc, *, scale, lane_dense):
    _flash_body(q_ref[0], k_ref[0], v_ref[0], mask_ref[0], scale, lane_dense,
                o_ref, m_sc, l_sc, acc_sc)


# ---------------------------------------------------------------------------
# Host-side helpers
# ---------------------------------------------------------------------------
def _vmem_limit_bytes():
    """Generation-aware scoped-VMEM limit: ~80% of the per-core VMEM."""
    cap = None
    try:
        info = pltpu.get_tpu_info()
        cap = getattr(info, "vmem_capacity_bytes", None)
    except Exception:
        cap = None
    if not cap:
        cap = 64 * 1024 * 1024            # conservative default (v7x per-TC VMEM)
    return int(cap * 0.8)


def _pick_tile(dim, cap, lane=False):
    """Largest divisor of `dim` <= cap, preferring MXU / lane / sublane friendly
    multiples (256, 128, 8); falls back to the full dim (one legal block)."""
    if dim <= cap:
        return dim
    divs = [t for t in range(cap, 0, -1) if dim % t == 0]
    prefs = (256, 128, 8, 1) if lane else (256, 8, 1)
    for m in prefs:
        best = max((t for t in divs if t % m == 0), default=0)
        if best >= 8:
            return best
    # TODO(synk): pad+mask fallback for prime-ish dims instead of one full block.
    return dim


def _weights_footprint(G, Gm, tq, Skv, D, Dv, itemsize):
    """Approx per-step VMEM bytes for the exact-softmax path (double-buffered)."""
    blk = itemsize * G * (tq * D + Skv * D + Skv * Dv + tq * Dv + tq * Skv)
    blk += Gm * tq * Skv                              # int8 mask block
    inter = 4 * G * tq * (2 * Skv + Dv)               # f32 scores/exp + out
    return 2 * blk + inter


def _flash_footprint(G, Gm, tq, tkv, D, Dv, itemsize):
    """Approx per-step VMEM bytes for the flash path (double-buffered)."""
    blk = itemsize * G * (tq * D + tkv * D + tkv * Dv + tq * Dv)
    blk += Gm * tq * tkv                              # int8 mask block
    scr = 4 * G * tq * (Dv + 2)                       # f32 acc + m + l scratch
    inter = 4 * G * tq * tkv * 2                      # f32 scores + exp
    return 2 * blk + scr + inter


def _pick_group(H, Dv, fits):
    """Largest divisor of H whose footprint fits the budget; prefers groups
    whose fused head dim (G*Dv) is lane-dense (multiple of 128)."""
    divs = [g for g in range(H, 0, -1) if H % g == 0]
    feasible = [g for g in divs if fits(g)]
    if not feasible:
        return 1
    if Dv % 128:
        for g in feasible:
            if g > 1 and (g * Dv) % 128 == 0:
                return g
    return feasible[0]


def _select_weights_tiling(Sq, Skv, D, Dv, H, itemsize, has_mask, use_h,
                           budget, q_tile, big_vmem):
    tq_cap = 512 if big_vmem else 256
    while True:
        tq = q_tile if q_tile is not None else _pick_tile(Sq, tq_cap)

        def fits(g):
            gm = (g if use_h else 1) if has_mask else 0
            return _weights_footprint(g, gm, tq, Skv, D, Dv, itemsize) <= budget

        G = _pick_group(H, Dv, fits)
        if fits(G) or q_tile is not None or tq_cap <= 16 or tq <= 16:
            return tq, G
        tq_cap //= 2


def _select_flash_tiling(Sq, Skv, D, Dv, H, itemsize, has_mask, use_h,
                         budget, q_tile, kv_tile):
    tq_cap, tkv_cap = 512, 512
    while True:
        tq = q_tile if q_tile is not None else _pick_tile(Sq, tq_cap)
        tkv = kv_tile if kv_tile is not None else _pick_tile(Skv, tkv_cap, lane=True)

        def fits(g):
            gm = (g if use_h else 1) if has_mask else 0
            return _flash_footprint(g, gm, tq, tkv, D, Dv, itemsize) <= budget

        G = _pick_group(H, Dv, fits)
        if fits(G):
            return tq, tkv, G
        if kv_tile is None and tkv_cap > 128 and tkv > 128:
            tkv_cap //= 2
            continue
        if q_tile is None and tq_cap > 64 and tq > 64:
            tq_cap //= 2
            continue
        return tq, tkv, G


def _collapse_lead(lead):
    if len(lead) == 0:
        return 1, 1
    if len(lead) == 1:
        return 1, lead[0]
    return math.prod(lead[:-1]), lead[-1]


def _normalize_mask(mask, B, H, Sq, Skv, lead):
    """Return (mask4 int8 of shape (B_m, H_m, Sq, Skv), B_m, H_m).

    Batch/head dims are kept un-broadcast (1 or full) so the BlockSpec
    index_map can reuse one mask block across heads / batches.
    """
    m = jnp.asarray(mask)
    rank = len(lead) + 2
    if m.ndim > rank:
        raise ValueError("mask has more dims than query")
    if m.ndim < rank:
        m = m.reshape((1,) * (rank - m.ndim) + m.shape)
    m = jnp.broadcast_to(m, m.shape[:-2] + (Sq, Skv))
    mlead = m.shape[:-2]
    H_m = mlead[-1] if mlead else 1
    if H_m not in (1, H):
        raise ValueError("mask head dim must be 1 or equal to the head dim")
    batch_dims = mlead[:-1]
    if all(d == 1 for d in batch_dims):
        B_m = 1
    else:
        m = jnp.broadcast_to(m, tuple(lead[:-1]) + (H_m, Sq, Skv))
        B_m = B
    m = m.reshape(B_m, H_m, Sq, Skv)
    return (m != 0).astype(jnp.int8), B_m, H_m


def _unpack_lane_dense(out, B, H, G, Sq, Dv):
    out = out.reshape(B, H // G, Sq, G, Dv)
    return out.transpose(0, 1, 3, 2, 4).reshape(B, H, Sq, Dv)


# ---------------------------------------------------------------------------
# Public wrapper
# ---------------------------------------------------------------------------
def scaled_dot_product_attention(query, key, value, mask=None, *,
                                 return_weights=True, q_tile=None, kv_tile=None):
    """Pallas TPU scaled dot-product attention.

    query: [..., Sq, D], key: [..., Skv, D], value: [..., Skv, Dv]
    mask:  broadcastable to [..., Sq, Skv]; positions where mask == 0 are
           masked with a finite -1e30 (fully-masked rows -> uniform weights).
    Returns (output [..., Sq, Dv], attention_weights [..., Sq, Skv] or None).
    """
    out_dtype = jnp.promote_types(jnp.promote_types(query.dtype, key.dtype),
                                  value.dtype)
    query = query.astype(out_dtype)
    key = key.astype(out_dtype)
    value = value.astype(out_dtype)

    Sq, D = query.shape[-2:]
    Skv = key.shape[-2]
    Dv = value.shape[-1]
    lead = query.shape[:-2]
    if key.shape[:-2] != lead or value.shape[:-2] != lead:
        raise ValueError("query/key/value must share leading dims")
    if key.shape[-1] != D or value.shape[-2] != Skv:
        raise ValueError("incompatible key/value shapes")

    B, H = _collapse_lead(lead)
    q4 = query.reshape(B, H, Sq, D)
    k4 = key.reshape(B, H, Skv, D)
    v4 = value.reshape(B, H, Skv, Dv)
    scale = 1.0 / math.sqrt(D)
    itemsize = jnp.dtype(out_dtype).itemsize

    mask4 = None
    B_m = H_m = 1
    if mask is not None:
        mask4, B_m, H_m = _normalize_mask(mask, B, H, Sq, Skv, lead)
    has_mask = mask4 is not None
    use_b = B_m != 1
    use_h = H_m != 1

    if q_tile is not None:
        q_tile = int(q_tile)
        if Sq % q_tile or (q_tile != Sq and q_tile % 8):
            raise ValueError("q_tile must divide Sq and be a multiple of 8")
    if kv_tile is not None:
        kv_tile = int(kv_tile)
        if Skv % kv_tile or (kv_tile != Skv and kv_tile % 8):
            raise ValueError("kv_tile must divide Skv and be a multiple of 8")

    vmem_limit = _vmem_limit_bytes()
    budget = int(vmem_limit * 0.9)                 # headroom for internal scratch
    big_vmem = vmem_limit >= 80 * 1024 * 1024      # 128 MiB parts (v5e/v6e)

    if return_weights:
        # ------------- exact softmax over the full key axis; weights written --
        tq, G = _select_weights_tiling(Sq, Skv, D, Dv, H, itemsize, has_mask,
                                       use_h, budget, q_tile, big_vmem)
        n_q = Sq // tq
        Gm = G if use_h else 1
        lane_dense = (Dv % 128 != 0) and (G > 1)
        grid = (B, H // G, n_q)

        def q_idx(b, h, qi):
            return (b, h, qi, 0)

        def kv_idx(b, h, qi):
            return (b, h, 0, 0)

        in_specs = [
            pl.BlockSpec((1, G, tq, D), q_idx),
            pl.BlockSpec((1, G, Skv, D), kv_idx),
            pl.BlockSpec((1, G, Skv, Dv), kv_idx),
        ]
        operands = [q4, k4, v4]
        if has_mask:
            in_specs.append(pl.BlockSpec(
                (1, Gm, tq, Skv),
                lambda b, h, qi: (b if use_b else 0, h if use_h else 0, qi, 0)))
            operands.append(mask4)
            kernel = functools.partial(_weights_masked_kernel, scale=scale,
                                       lane_dense=lane_dense)
        else:
            kernel = functools.partial(_weights_kernel, scale=scale,
                                       lane_dense=lane_dense)

        if lane_dense:
            o_shape = jax.ShapeDtypeStruct((B, H // G, Sq, G * Dv), out_dtype)
            o_spec = pl.BlockSpec((1, 1, tq, G * Dv),
                                  lambda b, h, qi: (b, h, qi, 0))
        else:
            o_shape = jax.ShapeDtypeStruct((B, H, Sq, Dv), out_dtype)
            o_spec = pl.BlockSpec((1, G, tq, Dv), q_idx)

        out, w = pl.pallas_call(
            kernel,
            out_shape=(o_shape, jax.ShapeDtypeStruct((B, H, Sq, Skv), out_dtype)),
            grid_spec=pltpu.PrefetchScalarGridSpec(
                num_scalar_prefetch=0,
                grid=grid,
                in_specs=in_specs,
                out_specs=(o_spec, pl.BlockSpec((1, G, tq, Skv), q_idx)),
            ),
            compiler_params=pltpu.CompilerParams(
                dimension_semantics=("parallel", "parallel", "parallel"),
                vmem_limit_bytes=vmem_limit,
            ),
        )(*operands)
        if lane_dense:
            out = _unpack_lane_dense(out, B, H, G, Sq, Dv)
        return out.reshape(*lead, Sq, Dv), w.reshape(*lead, Sq, Skv)

    # ---------------- flash-style: kv grid axis + online softmax -------------
    tq, tkv, G = _select_flash_tiling(Sq, Skv, D, Dv, H, itemsize, has_mask,
                                      use_h, budget, q_tile, kv_tile)
    n_q, n_kv = Sq // tq, Skv // tkv
    Gm = G if use_h else 1
    lane_dense = (Dv % 128 != 0) and (G > 1)
    grid = (B, H // G, n_q, n_kv)

    in_specs = [
        pl.BlockSpec((1, G, tq, D), lambda b, h, qi, ki: (b, h, qi, 0)),
        pl.BlockSpec((1, G, tkv, D), lambda b, h, qi, ki: (b, h, ki, 0)),
        pl.BlockSpec((1, G, tkv, Dv), lambda b, h, qi, ki: (b, h, ki, 0)),
    ]
    operands = [q4, k4, v4]
    if has_mask:
        in_specs.append(pl.BlockSpec(
            (1, Gm, tq, tkv),
            lambda b, h, qi, ki: (b if use_b else 0, h if use_h else 0, qi, ki)))
        operands.append(mask4)
        kernel = functools.partial(_flash_masked_kernel, scale=scale,
                                   lane_dense=lane_dense)
    else:
        kernel = functools.partial(_flash_kernel, scale=scale,
                                   lane_dense=lane_dense)

    if lane_dense:
        o_shape = jax.ShapeDtypeStruct((B, H // G, Sq, G * Dv), out_dtype)
        o_spec = pl.BlockSpec((1, 1, tq, G * Dv),
                              lambda b, h, qi, ki: (b, h, qi, 0))
    else:
        o_shape = jax.ShapeDtypeStruct((B, H, Sq, Dv), out_dtype)
        o_spec = pl.BlockSpec((1, G, tq, Dv), lambda b, h, qi, ki: (b, h, qi, 0))

    out = pl.pallas_call(
        kernel,
        out_shape=o_shape,
        grid_spec=pltpu.PrefetchScalarGridSpec(
            num_scalar_prefetch=0,
            grid=grid,
            in_specs=in_specs,
            out_specs=o_spec,
            scratch_shapes=[
                pltpu.VMEM((G, tq, 1), jnp.float32),    # running max
                pltpu.VMEM((G, tq, 1), jnp.float32),    # running denom
                pltpu.VMEM((G, tq, Dv), jnp.float32),   # output accumulator
            ],
        ),
        compiler_params=pltpu.CompilerParams(
            dimension_semantics=("parallel", "parallel", "parallel", "arbitrary"),
            vmem_limit_bytes=vmem_limit,
        ),
    )(*operands)
    if lane_dense:
        out = _unpack_lane_dense(out, B, H, G, Sq, Dv)
    return out.reshape(*lead, Sq, Dv), None


# ---------------------------------------------------------------------------
# Pure-JAX reference and self-test
# ---------------------------------------------------------------------------
def _reference(query, key, value, mask=None):
    d_k = query.shape[-1]
    scores = jnp.matmul(query, jnp.swapaxes(key, -2, -1)) / math.sqrt(d_k)
    if mask is not None:
        scores = jnp.where(mask == 0, _NEG_INF, scores)
    w = jax.nn.softmax(scores, axis=-1)
    return jnp.matmul(w, value), w


if __name__ == "__main__":
    # Small deterministic inputs: batch=2, heads=4, seq=8, d_k=32.
    B, H, S, D = 2, 4, 8, 32
    root = jax.random.PRNGKey(0)
    kq, kk, kv, km = jax.random.split(root, 4)
    q = jax.random.normal(kq, (B, H, S, D), dtype=jnp.float32)
    k = jax.random.normal(kk, (B, H, S, D), dtype=jnp.float32)
    v = jax.random.normal(kv, (B, H, S, D), dtype=jnp.float32)

    TOL = dict(atol=5e-3, rtol=5e-3)

    # 1) unmasked, weights returned (module semantics); lane-dense output path
    out, w = scaled_dot_product_attention(q, k, v)
    jax.block_until_ready((out, w))
    ref_out, ref_w = _reference(q, k, v)
    assert jnp.allclose(out, ref_out, **TOL)
    assert jnp.allclose(w, ref_w, **TOL)

    # 2) masked; mask broadcasts over heads -> DMA'd once per head group
    mask = (jax.random.uniform(km, (B, 1, S, S)) > 0.3).astype(jnp.int32)
    mask = mask.at[..., 0].set(1)  # keep every row at least partly unmasked
    out_m, w_m = scaled_dot_product_attention(q, k, v, mask)
    jax.block_until_ready((out_m, w_m))
    ref_out_m, ref_w_m = _reference(q, k, v, mask)
    assert jnp.allclose(out_m, ref_out_m, **TOL)
    assert jnp.allclose(w_m, ref_w_m, **TOL)

    # 3) flash path (no O(S^2) weights written)
    out_f, w_none = scaled_dot_product_attention(q, k, v, mask,
                                                 return_weights=False)
    jax.block_until_ready(out_f)
    assert w_none is None
    assert jnp.allclose(out_f, ref_out_m, **TOL)

    # 4) bf16 inputs go straight to the MXU (loose smoke-test tolerance)
    qb, kb, vb = (x.astype(jnp.bfloat16) for x in (q, k, v))
    out_b, _ = scaled_dot_product_attention(qb, kb, vb)
    jax.block_until_ready(out_b)
    assert jnp.allclose(out_b.astype(jnp.float32), ref_out, atol=1e-1, rtol=1e-1)

    # 5) larger shape exercising real q/kv tiling + online-softmax accumulation
    B2, H2, S2, D2 = 2, 2, 256, 64
    k2q, k2k, k2v, k2m = jax.random.split(jax.random.PRNGKey(1), 4)
    q2 = jax.random.normal(k2q, (B2, H2, S2, D2), dtype=jnp.float32)
    k2 = jax.random.normal(k2k, (B2, H2, S2, D2), dtype=jnp.float32)
    v2 = jax.random.normal(k2v, (B2, H2, S2, D2), dtype=jnp.float32)
    mask2 = (jax.random.uniform(k2m, (B2, 1, S2, S2)) > 0.1).astype(jnp.int32)
    mask2 = mask2.at[..., 0].set(1)
    ref_out2, ref_w2 = _reference(q2, k2, v2, mask2)
    out2, w2 = scaled_dot_product_attention(q2, k2, v2, mask2, q_tile=128)
    jax.block_until_ready((out2, w2))
    assert jnp.allclose(out2, ref_out2, **TOL)
    assert jnp.allclose(w2, ref_w2, **TOL)
    out2f, _ = scaled_dot_product_attention(q2, k2, v2, mask2,
                                            return_weights=False,
                                            q_tile=128, kv_tile=128)
    jax.block_until_ready(out2f)
    assert jnp.allclose(out2f, ref_out2, **TOL)

    # 6) fully-masked-row robustness: finite sentinel -> no NaN (uniform row)
    mask_fm = jnp.ones((B, 1, S, S), jnp.int32).at[:, :, 0, :].set(0)
    out_fm, w_fm = scaled_dot_product_attention(q, k, v, mask_fm)
    jax.block_until_ready((out_fm, w_fm))
    assert bool(jnp.isfinite(out_fm).all()) and bool(jnp.isfinite(w_fm).all())

    print("KERNEL_OK")
</pallas_src>

<mosaic_0001>
module attributes {stable_mosaic.version = 11 : i64} {
  func.func @_weights_kernel(%arg0: i32, %arg1: i32, %arg2: i32, %arg3: memref<1x4x8x32xf32, #tpu.memory_space<vmem>>, %arg4: memref<1x4x8x32xf32, #tpu.memory_space<vmem>>, %arg5: memref<1x4x8x32xf32, #tpu.memory_space<vmem>>, %arg6: memref<1x1x8x128xf32, #tpu.memory_space<vmem>>, %arg7: memref<1x4x8x8xf32, #tpu.memory_space<vmem>>) attributes {dimension_semantics = [#tpu.dimension_semantics<parallel>, #tpu.dimension_semantics<parallel>, #tpu.dimension_semantics<parallel>], iteration_bounds = array<i64: 2, 1, 1>, scalar_prefetch = 0 : i64, scratch_operands = 0 : i64, tpu.core_type = #tpu.core_type<tc>, window_params = [{transform_indices = @transform_0, window_bounds = array<i64: 1, 4, 8, 32>}, {transform_indices = @transform_1, window_bounds = array<i64: 1, 4, 8, 32>}, {transform_indices = @transform_2, window_bounds = array<i64: 1, 4, 8, 32>}, {transform_indices = @transform_3, window_bounds = array<i64: 1, 1, 8, 128>}, {transform_indices = @transform_4, window_bounds = array<i64: 1, 4, 8, 8>}]} {
    %c0 = arith.constant 0 : index
    %c0_0 = arith.constant 0 : index
    %c0_1 = arith.constant 0 : index
    %c0_2 = arith.constant 0 : index
    %0 = vector.load %arg3[%c0, %c0_0, %c0_1, %c0_2] : memref<1x4x8x32xf32, #tpu.memory_space<vmem>>, vector<1x4x8x32xf32>
    %1 = vector.shape_cast %0 : vector<1x4x8x32xf32> to vector<4x8x32xf32>
    %c0_3 = arith.constant 0 : index
    %c0_4 = arith.constant 0 : index
    %c0_5 = arith.constant 0 : index
    %c0_6 = arith.constant 0 : index
    %2 = vector.load %arg4[%c0_3, %c0_4, %c0_5, %c0_6] : memref<1x4x8x32xf32, #tpu.memory_space<vmem>>, vector<1x4x8x32xf32>
    %3 = vector.shape_cast %2 : vector<1x4x8x32xf32> to vector<4x8x32xf32>
    %c0_7 = arith.constant 0 : index
    %c0_8 = arith.constant 0 : index
    %c0_9 = arith.constant 0 : index
    %c0_10 = arith.constant 0 : index
    %4 = vector.load %arg5[%c0_7, %c0_8, %c0_9, %c0_10] : memref<1x4x8x32xf32, #tpu.memory_space<vmem>>, vector<1x4x8x32xf32>
    %5 = vector.shape_cast %4 : vector<1x4x8x32xf32> to vector<4x8x32xf32>
    %cst = arith.constant 0.176776692 : f32
    %6 = vector.broadcast %cst : f32 to vector<4x8x32xf32>
    %7 = arith.mulf %1, %6 : vector<4x8x32xf32>
    %cst_11 = arith.constant dense<0.000000e+00> : vector<4x8x8xf32>
    %8 = tpu.matmul %7, %3, %cst_11 {dimension_numbers = #tpu.dot_dimension_numbers<[2], [2], [1], [1], [0, 0, 0, 1, 1, 1], [0], [0]>} : vector<4x8x32xf32>, vector<4x8x32xf32>, vector<4x8x8xf32> -> vector<4x8x8xf32>
    %cst_12 = arith.constant dense<0xFF800000> : vector<4x8xf32>
    %9 = vector.multi_reduction <maximumf>, %8, %cst_12 [2] : vector<4x8x8xf32> to vector<4x8xf32>
    %10 = vector.shape_cast %9 : vector<4x8xf32> to vector<4x8x1xf32>
    %11 = vector.broadcast %10 : vector<4x8x1xf32> to vector<4x8x8xf32>
    %12 = arith.subf %8, %11 : vector<4x8x8xf32>
    %13 = math.exp %12 : vector<4x8x8xf32>
    %cst_13 = arith.constant dense<0.000000e+00> : vector<4x8xf32>
    %14 = vector.multi_reduction <add>, %13, %cst_13 [2] : vector<4x8x8xf32> to vector<4x8xf32>
    %15 = vector.shape_cast %14 : vector<4x8xf32> to vector<4x8x1xf32>
    %16 = vector.broadcast %15 : vector<4x8x1xf32> to vector<4x8x8xf32>
    %17 = arith.divf %13, %16 : vector<4x8x8xf32>
    %cst_14 = arith.constant dense<0.000000e+00> : vector<4x8x32xf32>
    %18 = tpu.matmul %17, %5, %cst_14 {dimension_numbers = #tpu.dot_dimension_numbers<[2], [1], [1], [2], [0, 0, 0, 1, 1, 2], [0], [0]>} : vector<4x8x8xf32>, vector<4x8x32xf32>, vector<4x8x32xf32> -> vector<4x8x32xf32>
    %19 = vector.extract_strided_slice %18 {offsets = [0, 0, 0], sizes = [1, 8, 32], strides = [1, 1, 1]} : vector<4x8x32xf32> to vector<1x8x32xf32>
    %20 = vector.shape_cast %19 : vector<1x8x32xf32> to vector<8x32xf32>
    %21 = vector.extract_strided_slice %18 {offsets = [1, 0, 0], sizes = [1, 8, 32], strides = [1, 1, 1]} : vector<4x8x32xf32> to vector<1x8x32xf32>
    %22 = vector.shape_cast %21 : vector<1x8x32xf32> to vector<8x32xf32>
    %23 = vector.extract_strided_slice %18 {offsets = [2, 0, 0], sizes = [1, 8, 32], strides = [1, 1, 1]} : vector<4x8x32xf32> to vector<1x8x32xf32>
    %24 = vector.shape_cast %23 : vector<1x8x32xf32> to vector<8x32xf32>
    %25 = vector.extract_strided_slice %18 {offsets = [3, 0, 0], sizes = [1, 8, 32], strides = [1, 1, 1]} : vector<4x8x32xf32> to vector<1x8x32xf32>
    %26 = vector.shape_cast %25 : vector<1x8x32xf32> to vector<8x32xf32>
    %27 = tpu.concatenate %20, %22, %24, %26 in 1 : vector<8x32xf32>, vector<8x32xf32>, vector<8x32xf32>, vector<8x32xf32> -> vector<8x128xf32>
    %c0_15 = arith.constant 0 : index
    %c0_16 = arith.constant 0 : index
    %c0_17 = arith.constant 0 : index
    %c0_18 = arith.constant 0 : index
    %28 = vector.load %arg6[%c0_15, %c0_16, %c0_17, %c0_18] : memref<1x1x8x128xf32, #tpu.memory_space<vmem>>, vector<1x1x8x128xf32>
    %29 = vector.shape_cast %28 : vector<1x1x8x128xf32> to vector<8x128xf32>
    %30 = vector.shape_cast %27 : vector<8x128xf32> to vector<1x1x8x128xf32>
    tpu.vector_store %arg6[%c0_15, %c0_16, %c0_17, %c0_18], %30 {strides = array<i32>} : memref<1x1x8x128xf32, #tpu.memory_space<vmem>>, vector<1x1x8x128xf32>,
    %c0_19 = arith.constant 0 : index
    %c0_20 = arith.constant 0 : index
    %c0_21 = arith.constant 0 : index
    %c0_22 = arith.constant 0 : index
    %31 = vector.load %arg7[%c0_19, %c0_20, %c0_21, %c0_22] : memref<1x4x8x8xf32, #tpu.memory_space<vmem>>, vector<1x4x8x8xf32>
    %32 = vector.shape_cast %31 : vector<1x4x8x8xf32> to vector<4x8x8xf32>
    %33 = vector.shape_cast %17 : vector<4x8x8xf32> to vector<1x4x8x8xf32>
    tpu.vector_store %arg7[%c0_19, %c0_20, %c0_21, %c0_22], %33 {strides = array<i32>} : memref<1x4x8x8xf32, #tpu.memory_space<vmem>>, vector<1x4x8x8xf32>,
    return
  }
  func.func @transform_0(%arg0: i32, %arg1: i32, %arg2: i32) -> (i32, i32, i32, i32) {
    %c0_i32 = arith.constant 0 : i32
    %c0_i32_0 = arith.constant 0 : i32
    return %arg0, %arg1, %arg2, %c0_i32 : i32, i32, i32, i32
  }
  func.func @transform_1(%arg0: i32, %arg1: i32, %arg2: i32) -> (i32, i32, i32, i32) {
    %c0_i32 = arith.constant 0 : i32
    %c0_i32_0 = arith.constant 0 : i32
    %c0_i32_1 = arith.constant 0 : i32
    return %arg0, %arg1, %c0_i32, %c0_i32_0 : i32, i32, i32, i32
  }
  func.func @transform_2(%arg0: i32, %arg1: i32, %arg2: i32) -> (i32, i32, i32, i32) {
    %c0_i32 = arith.constant 0 : i32
    %c0_i32_0 = arith.constant 0 : i32
    %c0_i32_1 = arith.constant 0 : i32
    return %arg0, %arg1, %c0_i32, %c0_i32_0 : i32, i32, i32, i32
  }
  func.func @transform_3(%arg0: i32, %arg1: i32, %arg2: i32) -> (i32, i32, i32, i32) {
    %c0_i32 = arith.constant 0 : i32
    %c0_i32_0 = arith.constant 0 : i32
    return %arg0, %arg1, %arg2, %c0_i32 : i32, i32, i32, i32
  }
  func.func @transform_4(%arg0: i32, %arg1: i32, %arg2: i32) -> (i32, i32, i32, i32) {
    %c0_i32 = arith.constant 0 : i32
    %c0_i32_0 = arith.constant 0 : i32
    return %arg0, %arg1, %arg2, %c0_i32 : i32, i32, i32, i32
  }
}

</mosaic_0001>

<bundles_post_ra>
// kernel: tpu_custom_call.1
= control target key start
LH: loop header
LB: loop body
LE: loop exit
PB: predicated region body
PF: predicated region fallthrough
CT: control target
= control target key end

     0   :  { %s2055_s0 = inlined_call_operand.hbm [shape: f32[2,4,8,32], index: 0, kind: input, shape index: {}]   ;;  %s2056_s1 = inlined_call_operand.hbm [shape: f32[2,4,8,32], index: 1, kind: input, shape index: {}]   ;;  %s2057_s2 = inlined_call_operand.hbm [shape: f32[2,4,8,32], index: 2, kind: input, shape index: {}]   ;;  %s2058_s3 = inlined_call_operand.hbm [shape: f32[2,1,8,128], index: 3, kind: output, shape index: {0}]   ;;  %s2059_s4 = inlined_call_operand.hbm [shape: f32[2,4,8,8], index: 4, kind: output, shape index: {1}]  }
   0x1   :  { %2071 = sst [smem:[#allocation19_spill]] %s2056_s1 }
   0x2   :  { %10 = vsyncpa [#allocation3], 0 }
   0x3   :  { %12 = vsyncpa [#allocation3 + $0x1], 0 }
   0x4   :  { %13 = vsyncpa [#allocation6], 0 }
   0x5   :  { %15 = vsyncpa [#allocation6 + $0x1], 0 }
   0x6   :  { %16 = vsyncpa [#allocation4], 0 }
   0x7   :  { %18 = vsyncpa [#allocation4 + $0x1], 0 }
   0x8   :  { %19 = vsyncpa [#allocation10], 0 }
   0x9   :  { %21 = vsyncpa [#allocation10 + $0x1], 0  ;;  %s1691_s15 = smov 0   ;;  %s1693_s16 = smov 0  }
   0xa   :  { %s1695_s17 = smov 0   ;;  %s1697_s18 = smov 0  }
   0xb   :  { %s1699_s19 = smov 0   ;;  %s1701_s20 = smov 0  }
   0xc LB: > { %2072 = sst [smem:[#allocation15_spill]] %s1646_s19  ;;  %s1722_s21 = sadd.s32 4294967295, %s1650_s20   ;;  %s1650_s20 = sphi %s1701_s20, %s27_s20   ;;  %s1646_s19 = sphi %s1699_s19, %s2097_s19   ;;  %s1642_s18 = sphi %s1697_s18, %s2096_s18   ;;  %s1638_s17 = sphi %s1695_s17, %s2100_s17   ;;  %s1634_s16 = sphi %s1693_s16, %s2099_s16   ;;  %s1630_s15 = sphi %s1691_s15, %s2098_s15  }
   0xd   : > { %2073 = sst [smem:[#allocation16_spill]] %s1650_s20  ;;  %s1243_s22 = sadd.s32 4294967294, %s1650_s20  }
   0xe   : > { %s46_s23 = sadd.s32 1, %s1646_s19  ;;  %s57_s24 = sadd.s32 1, %s1638_s17 }
   0xf   : > { %p48_p0 = scmp.ge.s32.totalorder %s46_s23, 2  ;;  %p64_p1 = scmp.ne.s32.totalorder %s1638_s17, %s1634_s16 }
  0x10   : > { %p65_p2 = scmp.eq.s32.totalorder %s1650_s20, 0  ;;  %p70_p3 = scmp.ne.s32.totalorder %s1634_s16, %s1630_s15 }
  0x11   : > { %s2102_s23 = smov (%p48_p0, %s46_s23), 0  ;;  %p71_p5 = scmp.eq.s32.totalorder %s1722_s21, 0 }
  0x12   : > { %2074 = sst [smem:[#allocation17_spill]] %s2102_s23  ;;  %p1734_p4 = por %p65_p2, %p64_p1 }
  0x13   : > { %s50_s26 = ssub.s32 %s1646_s19, %s2102_s23  ;;  %p154_p6 = scmp.eq.s32.totalorder %s1722_s21, 1 }
  0x14   : > { %p55_p7 = scmp.eq.s32.totalorder %s50_s26, 0  ;;  %p1742_p8 = por %p71_p5, %p70_p3 }
  0x15   : > { %p1746_p9 = por %p154_p6, %p64_p1  ;;  %p160_p10 = scmp.eq.s32.totalorder %s1243_s22, 1 }
  0x16   : > { %s2076_s27 = scalar_select %p1742_p8, 1, 0 }
  0x17   : > { %s2077_s28 = scalar_select %p1746_p9, 1, 0 }
  0x18   : > { %s1751_s29 = scalar_select %p55_p7, %s1638_s17, %s57_s24  }
  0x19   : > { %p1753_p11 = por %p160_p10, %p70_p3  ;;  %p1367_p13 = scmp.lt.s32.totalorder %s1650_s20, 2 }
  0x1a   : > { %2078 = sst [smem:[#allocation18_spill]] %s1751_s29  ;;  %s2060_s5 = sand.u32 1, %s1638_s17  }
  0x1b   : > { %s2079_s30 = scalar_select %p1753_p11, 1, 0 }
  0x1c   : > { %s1762_s6 = sshll.u32 %s2060_s5, 5  ;;  %s1765_s7 = sshll.u32 %s1646_s19, 9 }
  0x1d   : > { %p1769_p0 = pnand %p1367_p13, %p1734_p4  ;;  %s234_s9 = sand.u32 1, %s1650_s20  }
  0x1e   : > { %s2081_s1 = sld [smem:[#allocation19_spill]]  ;;  %s238_s13 = scalar_lea.vmem [#allocation5], %s1762_s6 }
  0x1f   : > { %s247_s14 = sshll.u32 %s238_s13, 4  ;;  %s1785_s22 = scalar_lea.sflag [#allocation6], %s234_s9  ;;  %s1782_s14 = int_to_ptr.vmem [resolvable:$true] %s247_s14 }
  0x20   : > { %p1791_p4 = pneg %p1769_p0 }
  0x24   : > { %s1778_s12 = scalar_lea.hbm %s2081_s1, %s1765_s7  ;;  %s1447_s11 = scalar_lea.hbm %s2081_s1, 1024 }
  0x25   : > { %s1442_s24 = scalar_lea.hbm %s1778_s12, 512  ;;  %p1448_p7 = scmp.lt.u32.totalorder %s1778_s12, %s2081_s1 }
  0x26   : > { %p1443_p3 = scmp.ne.s32.totalorder %s1778_s12, %s1442_s24  ;;  %p1449_p10 = scmp.lt.u32.totalorder %s1447_s11, %s1442_s24 }
  0x27   : > { %p1451_p12 = scmp.lt.u32.totalorder %s1442_s24, %s1778_s12 }
  0x28   : > { %p1445_p5 = pnand %p1791_p4, %p1443_p3  ;;  %p1450_p13 = por %p1449_p10, %p1448_p7 }
  0x2a   : > { %p1446_p6 = pneg %p1445_p5  ;;  %p1452_p1 = por %p1451_p12, %p1450_p13 }
  0x2c   : > { %p1453_p2 = pnand %p1452_p1, %p1446_p6 }
  0x2e   : > { %1456 = shalt.err (!%p1453_p2)
}
  0x2f   : > { %s1457_s9 = scalar_lea.vmem %s1782_s14, 512  ;;  %s1652_s26 = smov [#allocation5]  }
  0x30   : > { %p1458_p3 = scmp.ne.s32.totalorder %s1782_s14, %s1457_s9  ;;  %s1462_s10 = sshll.u32 %s1652_s26, 4  ;;  %s1463_s10 = int_to_ptr.vmem [resolvable:$false] %s1462_s10 }
  0x31   : > { %s1464_s5 = scalar_lea.vmem %s1463_s10, 1024  ;;  %p1465_p9 = scmp.lt.s32.totalorder %s1782_s14, %s1463_s10 }
  0x32   : > { %p1460_p5 = pnand %p1458_p3, %p1791_p4  ;;  %p1466_p8 = scmp.lt.s32.totalorder %s1464_s5, %s1457_s9 }
  0x34   : > { %p1461_p11 = pneg %p1460_p5  ;;  %p1467_p7 = por %p1466_p8, %p1465_p9 }
  0x36   : > { %p1468_p10 = pnand %p1467_p7, %p1461_p11 }
  0x38   : > { %1471 = shalt.err (!%p1468_p10)
}
  0x39   : > { %s2063_s24 = smov 128   ;;  %s2065_s11 = smov 8  }
  0x3a   : > { %1356 = dma.hbm_to_vmem [thread:$0]  (!%p1769_p0), %s1778_s12, 512, %s1782_s14, %s1785_s22, %s2063_s24, %s2063_s24, %s2065_s11  }
  0x3b   : > { %p2083_p8 = scmp.lt.s32.totalorder %s1650_s20, 3  ;;  %p2084_p9 = scmp.ge.s32.totalorder %s1650_s20, 1 }
  0x3c   : > { %s1830_s10 = scalar_lea.hbm %s2055_s0, %s1765_s7  ;;  %s214_s5 = scalar_lea.vmem [#allocation2], %s1762_s6 }
  0x3d   : > { %p1822_p11 = pnand %p2084_p9, %p2083_p8  ;;  %s224_s1 = sshll.u32 %s214_s5, 4  ;;  %s1833_s1 = int_to_ptr.vmem [resolvable:$true] %s224_s1 }
  0x3e   : > { %s1839_s24 = scalar_lea.hbm %s2057_s2, %s1765_s7  ;;  %s2086_s11 = sand.u32 1, %s1638_s17  }
  0x3f   : > { %s2085_s13 = scalar_select %p1822_p11, 1, 0 }
  0x40   : > { %s1843_s23 = scalar_lea.sflag [#allocation3], %s2086_s11  ;;  %s1472_s19 = scalar_lea.hbm %s1830_s10, 512 }
  0x41   : > { %p1473_p12 = scmp.ne.s32.totalorder %s1830_s10, %s1472_s19  ;;  %s1477_s29 = scalar_lea.hbm %s2055_s0, 1024 }
  0x42   : > { %p1478_p6 = scmp.lt.u32.totalorder %s1830_s10, %s2055_s0  ;;  %p1479_p13 = scmp.lt.u32.totalorder %s1477_s29, %s1472_s19 }
  0x43   : > { %p1475_p1 = pnand %p1473_p12, %p1791_p4  ;;  %p1481_p5 = scmp.lt.u32.totalorder %s1472_s19, %s1830_s10 }
  0x44   : > { %p1480_p3 = por %p1479_p13, %p1478_p6 }
  0x45   : > { %p1476_p2 = pneg %p1475_p1 }
  0x46   : > { %p1482_p7 = por %p1481_p5, %p1480_p3 }
  0x48   : > { %p1483_p10 = pnand %p1482_p7, %p1476_p2 }
  0x4a   : > { %1486 = shalt.err (!%p1483_p10)
}
  0x4b   : > { %s1487_s7 = scalar_lea.vmem %s1833_s1, 512  ;;  %s1655_s11 = smov [#allocation2]  }
  0x4c   : > { %p1488_p8 = scmp.ne.s32.totalorder %s1833_s1, %s1487_s7  ;;  %s1492_s12 = sshll.u32 %s1655_s11, 4  ;;  %s1493_s12 = int_to_ptr.vmem [resolvable:$false] %s1492_s12 }
  0x4d   : > { %s1494_s20 = scalar_lea.vmem %s1493_s12, 1024  ;;  %p1495_p1 = scmp.lt.s32.totalorder %s1833_s1, %s1493_s12 }
  0x4e   : > { %p1490_p9 = pnand %p1488_p8, %p1791_p4  ;;  %p1496_p11 = scmp.lt.s32.totalorder %s1494_s20, %s1487_s7 }
  0x50   : > { %p1491_p12 = pneg %p1490_p9  ;;  %p1497_p6 = por %p1496_p11, %p1495_p1 }
  0x52   : > { %p1498_p13 = pnand %p1497_p6, %p1491_p12 }
  0x54   : > { %1501 = shalt.err (!%p1498_p13)
}
  0x55   : > { %s2087_s19 = smov 8   ;;  %s2088_s29 = smov 128  }
  0x56   : > { %1353 = dma.hbm_to_vmem [thread:$0]  (!%p1769_p0), %s1830_s10, 512, %s1833_s1, %s1843_s23, %s2088_s29, %s2088_s29, %s2087_s19  }
  0x57   : > { %s261_s14 = scalar_lea.vmem [#allocation7], %s1762_s6  ;;  %s1502_s26 = scalar_lea.hbm %s1839_s24, 512 }
  0x58   : > { %s270_s9 = sshll.u32 %s261_s14, 4  ;;  %p1503_p11 = scmp.ne.s32.totalorder %s1839_s24, %s1502_s26  ;;  %s1871_s9 = int_to_ptr.vmem [resolvable:$true] %s270_s9 }
  0x59   : > { %s1507_s11 = scalar_lea.hbm %s2057_s2, 1024  ;;  %p1508_p5 = scmp.lt.u32.totalorder %s1839_s24, %s2057_s2 }
  0x5a   : > { %p1505_p2 = pnand %p1503_p11, %p1791_p4  ;;  %p1509_p7 = scmp.lt.u32.totalorder %s1507_s11, %s1502_s26 }
  0x5b   : > { %p1511_p8 = scmp.lt.u32.totalorder %s1502_s26, %s1839_s24 }
  0x5c   : > { %p1506_p3 = pneg %p1505_p2  ;;  %p1510_p10 = por %p1509_p7, %p1508_p5 }
  0x5e   : > { %p1512_p9 = por %p1511_p8, %p1510_p10 }
  0x60   : > { %p1513_p12 = pnand %p1512_p9, %p1506_p3 }
  0x62   : > { %1516 = shalt.err (!%p1513_p12)
}
  0x63   : > { %s1517_s1 = scalar_lea.vmem %s1871_s9, 512  ;;  %s1656_s23 = smov [#allocation7]  }
  0x64   : > { %p1518_p1 = scmp.ne.s32.totalorder %s1871_s9, %s1517_s1  ;;  %s1522_s6 = sshll.u32 %s1656_s23, 4  ;;  %s1523_s6 = int_to_ptr.vmem [resolvable:$false] %s1522_s6 }
  0x65   : > { %s1524_s10 = scalar_lea.vmem %s1523_s6, 1024  ;;  %p1525_p11 = scmp.lt.s32.totalorder %s1871_s9, %s1523_s6 }
  0x66   : > { %p1520_p6 = pnand %p1518_p1, %p1791_p4  ;;  %p1526_p2 = scmp.lt.s32.totalorder %s1524_s10, %s1517_s1 }
  0x68   : > { %p1521_p13 = pneg %p1520_p6  ;;  %p1527_p5 = por %p1526_p2, %p1525_p11 }
  0x6a   : > { %p1528_p7 = pnand %p1527_p5, %p1521_p13 }
  0x6c   : > { %1531 = shalt.err (!%p1528_p7)
}
  0x6d   : > { %1359 = dma.hbm_to_vmem [thread:$0]  (!%p1769_p0), %s1839_s24, 512, %s1871_s9, %s1785_s22, %s2088_s29, %s2088_s29, %s2087_s19  }
  0x6e   : > { %p2089_p4 = scmp.ne.s32.totalorder %s2085_s13, 0 }
  0x6f   : > { %s1901_s25 = sand.u32 (!%p2089_p4), 1, %s1634_s16   ;;  %p2090_p3 = scmp.ne.s32.totalorder (!%p2089_p4), %s2076_s27, 0 }
  0x70   : > { %282 = sbr.rel (%p2089_p4) target bundleno = 1017 (0x3f9), region = 32  ;;  %s1904_s14 = sshll.u32 (!%p2089_p4), %s1901_s25, 5 }
  0x71   : > { %s285_s8 = scalar_lea.sflag (!%p2089_p4), [#allocation3], %s1901_s25  ;;  %s288_s26 = scalar_lea.vmem (!%p2089_p4), [#allocation2], %s1904_s14 }
  0x77   : > { %1613 = dma.done.wait (%p2090_p3), %s285_s8, 512  }
  0x78   : > { %1615 = vsyncadd (%p2090_p3), %s285_s8, 4294966784  ;;  %s293_s22 = sand.u32 1, %s1722_s21   ;;  %s297_s13 = scalar_lea.vmem [#allocation5], %s1904_s14 }
  0x79   : > { %s294_s24 = scalar_lea.sflag [#allocation6], %s293_s22 }
  0x7a   : > { %1617 = dma.done.wait (%p2090_p3), %s294_s24, 1024  }
  0x7b   : > { %1619 = vsyncadd (%p2090_p3), %s294_s24, 4294966272  ;;  %v1657_v0 = vmov 0.0   ;;  %vm1658_vm0 = vmmov 0   ;;  %vm366_vm1 = vcmask 261120   ;;  %v354_v1 = vld [vmem:[%s297_s13] sm:$0xff]  ;;  %v355_v3 = vld [vmem:[%s297_s13 + $0x8] sm:$0xff] }
  0x7c   : > { %1300 = vmatprep.subr.mxu0 %v1657_v0  ;;  %1302 = vmatprep.mubr.msk.f32.mxu0 %vm1658_vm0, %v1657_v0  ;;  %v350_v2 = vld [vmem:[%s288_s26] sm:$0xff]  ;;  %v351_v5 = vld [vmem:[%s288_s26 + $0x8] sm:$0xff]  ;;  %v352_v6 = vld [vmem:[%s288_s26 + $0x10] sm:$0xff]  ;;  %vm671_vm2 = vcmask 64512   ;;  %s306_s21 = scalar_lea.vmem [#allocation7], %s1904_s14  ;;  %s345_s27 = scalar_lea.vmem [#allocation9], %s1904_s14 }
  0x7d   : > { %1305 = vmatprep.subr.mxu1 %v1657_v0  ;;  %1307 = vmatprep.mubr.msk.f32.mxu1 %vm1658_vm0, %v1657_v0  ;;  %v362_v4 = vmul.f32 0.17677669, %v350_v2  ;;  %v356_v7 = vld [vmem:[%s297_s13 + $0x10] sm:$0xff]  ;;  %v363_v8 = vmul.f32 0.17677669, %v351_v5  ;;  %v353_v9 = vld [vmem:[%s288_s26 + $0x18] sm:$0xff] }
  0x7e   : > { %1301 = vmatpush3.xpose.msk.msra.mxu0 %vm366_vm1, %v354_v1  ;;  %1306 = vmatpush3.xpose.msk.msra.mxu1 %vm366_vm1, %v355_v3  ;;  %v357_v10 = vld [vmem:[%s297_s13 + $0x18] sm:$0xff]  ;;  %v364_v11 = vmul.f32 0.17677669, %v352_v6  ;;  %v365_v12 = vmul.f32 0.17677669, %v353_v9  ;;  %v358_v45 = vld [vmem:[%s306_s21] sm:$0xff] }
  0x7f   : > { %1310 = vmatprep.subr.mxu0 %v1657_v0  ;;  %1315 = vmatprep.subr.mxu1 %v1657_v0  ;;  %v359_v46 = vld [vmem:[%s306_s21 + $0x8] sm:$0xff]  ;;  %v360_v53 = vld [vmem:[%s306_s21 + $0x10] sm:$0xff]  ;;  %v361_v57 = vld [vmem:[%s306_s21 + $0x18] sm:$0xff]  ;;  %s1283_s19 = sshll.u32 %s1642_s18, 9  ;;  %s1067_s29 = sshll.u32 %s345_s27, 4  ;;  %s1974_s29 = int_to_ptr.vmem [resolvable:$true] %s1067_s29 }
  0x80   : > { %s1972_s7 = scalar_lea.hbm %s2059_s4, %s1283_s19  ;;  %s1036_s11 = scalar_lea.sflag [#allocation10], %s1901_s25 }
  0x81   : > { %1303 = vmatmul.mubr.msk.f32.vlgmr.msra.gmra.mrb[0].mxu0 %vm366_vm1, %v362_v4  ;;  %1308 = vmatmul.mubr.msk.f32.vlgmr.msra.gmra.mrb[0].mxu1 %vm366_vm1, %v363_v8  ;;  %s1532_s12 = scalar_lea.vmem %s1974_s29, 512  ;;  %p2091_p10 = scmp.ne.s32.totalorder %s2077_s28, 0 }
  0x82   : > { %1311 = vmatpush3.xpose.msk.msra.mxu0 %vm366_vm1, %v356_v7  ;;  %1312 = vmatprep.mubr.msk.f32.mxu0 %vm1658_vm0, %v1657_v0  ;;  %p1533_p0 = scmp.ne.s32.totalorder %s1974_s29, %s1532_s12  ;;  %s1659_s20 = smov [#allocation9]  }
  0x83   : > { %1316 = vmatpush3.xpose.msk.msra.mxu1 %vm366_vm1, %v357_v10  ;;  %1317 = vmatprep.mubr.msk.f32.mxu1 %vm1658_vm0, %v1657_v0  ;;  %s1536_s1 = sshll.u32 %s1659_s20, 4  ;;  %s1537_s1 = int_to_ptr.vmem [resolvable:$false] %s1536_s1 }
  0x84   : > { %1320 = vmatprep.subr.mxu0 %v1657_v0  ;;  %1325 = vmatprep.subr.mxu1 %v1657_v0  ;;  %p1534_p8 = pnand %p1533_p0, %p2091_p10  ;;  %s1538_s23 = scalar_lea.vmem %s1537_s1, 1024 }
  0x85   : > { %1313 = vmatmul.mubr.msk.f32.vlgmr.msra.gmra.mrb[2].mxu0 %vm366_vm1, %v364_v11  ;;  %p1539_p12 = scmp.lt.s32.totalorder %s1974_s29, %s1537_s1  ;;  %p1540_p1 = scmp.lt.s32.totalorder %s1538_s23, %s1532_s12 }
  0x86   : > { %1318 = vmatmul.mubr.msk.f32.vlgmr.msra.gmra.mrb[2].mxu1 %vm366_vm1, %v365_v12  ;;  %1322 = vmatprep.mubr.msk.f32.mxu0 %vm1658_vm0, %v1657_v0  ;;  %p1535_p9 = pneg %p1534_p8 }
  0x87   : > { %1327 = vmatprep.mubr.msk.f32.mxu1 %vm1658_vm0, %v1657_v0  ;;  %1321 = vmatpush3.msra.mxu0 %v358_v45  ;;  %p1541_p6 = por %p1540_p1, %p1539_p12 }
  0x88   : > { %1330 = vmatprep.subr.mxu0 %v1657_v0  ;;  %1326 = vmatpush3.msra.mxu1 %v359_v46 }
  0x89   : > { %1335 = vmatprep.subr.mxu1 %v1657_v0  ;;  %p1542_p13 = pnand %p1541_p6, %p1535_p9 }
 0x154   : > { %v439_v13 = vpop.f32.mrb[0].mxu0  ;;  %v515_v14 = vpop.f32.mrb[0].mxu1 }
 0x155   : > { %v1304_v15 = vpop.f32.mrb[1].mxu0  ;;  %v672_v16 = vsel %vm671_vm2, %v439_v13, -inf  ;;  %v1309_v17 = vpop.f32.mrb[1].mxu1  ;;  %v675_v18 = vsel %vm671_vm2, %v515_v14, -inf }
 0x156   : > { %673 = vmax.xlane.f32.xlu0 %v672_v16 }
 0x158   : > { %v591_v19 = vpop.f32.mrb[2].mxu0 }
 0x159   : > { %v1314_v20 = vpop.f32.mrb[3].mxu0  ;;  %v678_v21 = vsel %vm671_vm2, %v591_v19, -inf  ;;  %v667_v22 = vpop.f32.mrb[2].mxu1 }
 0x15a   : > { %676 = vmax.xlane.f32.xlu0 %v675_v18  ;;  %679 = vmax.xlane.f32.xlu1 %v678_v21  ;;  %v1319_v23 = vpop.f32.mrb[3].mxu1  ;;  %v681_v24 = vsel %vm671_vm2, %v667_v22, -inf }
 0x15e   : > { %682 = vmax.xlane.f32.xlu1 %v681_v24 }
 0x1e3   : > { %v674_v25 = vpop.xlane.xlu0 %673 }
 0x1e4   : > { %v684_v26 = vsub.f32 %v439_v13, %v674_v25 }
 0x1e6   : > { %v688_v27 = vmul.f32 1.442695, %v684_v26 }
 0x1e7   : > { %v677_v28 = vpop.xlane.xlu0 %676  ;;  %v680_v29 = vpop.xlane.xlu1 %679 }
 0x1e8   : > { %1426 = vpow2.f32 %v688_v27  ;;  %v685_v30 = vsub.f32 %v515_v14, %v677_v28  ;;  %v686_v31 = vsub.f32 %v591_v19, %v680_v29 }
 0x1ea   : > { %v690_v32 = vmul.f32 1.442695, %v685_v30  ;;  %v692_v33 = vmul.f32 1.442695, %v686_v31 }
 0x1eb   : > { %v683_v34 = vpop.xlane.xlu1 %682 }
 0x1ec   : > { %1428 = vpow2.f32 %v690_v32  ;;  %v687_v35 = vsub.f32 %v667_v22, %v683_v34 }
 0x1ed   : > { %1430 = vpow2.f32 %v692_v33 }
 0x1ee   : > { %v694_v36 = vmul.f32 1.442695, %v687_v35 }
 0x1f0   : > { %1432 = vpow2.f32 %v694_v36 }
 0x1f2   : > { %v1427_v37 = vpop.eup %1426 }
 0x1f3   : > { %v696_v38 = vsel %vm671_vm2, %v1427_v37, 0.0 }
 0x1f4   : > { %697 = vadd.xlane.f32.xlu0 %v696_v38 }
 0x1f6   : > { %v1429_v39 = vpop.eup %1428 }
 0x1f7   : > { %v1431_v40 = vpop.eup %1430  ;;  %v699_v41 = vsel %vm671_vm2, %v1429_v39, 0.0 }
 0x1f8   : > { %700 = vadd.xlane.f32.xlu1 %v699_v41  ;;  %v702_v42 = vsel %vm671_vm2, %v1431_v40, 0.0 }
 0x1f9   : > { %703 = vadd.xlane.f32.xlu0 %v702_v42 }
 0x1fa   : > { %v1433_v43 = vpop.eup %1432 }
 0x1fb   : > { %v705_v44 = vsel %vm671_vm2, %v1433_v43, 0.0 }
 0x1fc   : > { %706 = vadd.xlane.f32.xlu1 %v705_v44 }
 0x281   : > { %v698_v47 = vpop.xlane.xlu0 %697 }
 0x282   : > { %1434 = vrcp.f32 %v698_v47 }
 0x285   : > { %v701_v48 = vpop.xlane.xlu1 %700 }
 0x286   : > { %v704_v49 = vpop.xlane.xlu0 %703  ;;  %1436 = vrcp.f32 %v701_v48 }
 0x287   : > { %1438 = vrcp.f32 %v704_v49 }
 0x289   : > { %v707_v50 = vpop.xlane.xlu1 %706 }
 0x28a   : > { %1440 = vrcp.f32 %v707_v50 }
 0x28c   : > { %v1435_v51 = vpop.eup %1434 }
 0x28d   : > { %v709_v52 = vmul.f32 %v1435_v51, %v1427_v37 }
 0x28f   : > { %1026 = vst.msk [vmem:[%s345_s27] sm:$0xff] %vm671_vm2, %v709_v52  ;;  %1323 = vmatmul.mubr.msk.f32.vlgmr.msra.gmra.mrb[4].mxu0 %vm671_vm2, %v709_v52 }
 0x290   : > { %v1437_v54 = vpop.eup %1436  ;;  %1331 = vmatpush3.msra.mxu0 %v360_v53  ;;  %1332 = vmatprep.mubr.msk.f32.mxu0 %vm1658_vm0, %v1657_v0 }
 0x291   : > { %v1439_v55 = vpop.eup %1438  ;;  %v711_v56 = vmul.f32 %v1437_v54, %v1429_v39 }
 0x292   : > { %v713_v58 = vmul.f32 %v1439_v55, %v1431_v40 }
 0x293   : > { %1027 = vst.msk [vmem:[%s345_s27 + $0x8] sm:$0xff] %vm671_vm2, %v711_v56  ;;  %1328 = vmatmul.mubr.msk.f32.vlgmr.msra.gmra.mrb[4].mxu1 %vm671_vm2, %v711_v56 }
 0x294   : > { %v1441_v59 = vpop.eup %1440  ;;  %1028 = vst.msk [vmem:[%s345_s27 + $0x10] sm:$0xff] %vm671_vm2, %v713_v58  ;;  %1333 = vmatmul.mubr.msk.f32.vlgmr.msra.gmra.mrb[6].mxu0 %vm671_vm2, %v713_v58  ;;  %1336 = vmatpush3.msra.mxu1 %v361_v57 }
 0x295   : > { %v715_v60 = vmul.f32 %v1441_v59, %v1433_v43  ;;  %1337 = vmatprep.mubr.msk.f32.mxu1 %vm1658_vm0, %v1657_v0 }
 0x297   : > { %1029 = vst.msk [vmem:[%s345_s27 + $0x18] sm:$0xff] %vm671_vm2, %v715_v60  ;;  %1338 = vmatmul.mubr.msk.f32.vlgmr.msra.gmra.mrb[6].mxu1 %vm671_vm2, %v715_v60 }
 0x362   : > { %v785_v61 = vpop.f32.mrb[4].mxu0 }
 0x363   : > { %v1324_v62 = vpop.f32.mrb[5].mxu0 }
 0x364   : > { %1545 = shalt.err (!%p1542_p13)
}
 0x365   : > { %s1546_s6 = scalar_lea.hbm %s1972_s7, 512  ;;  %s1550_s8 = scalar_lea.hbm %s2059_s4, 1024 }
 0x366   : > { %p1547_p11 = scmp.ne.s32.totalorder %s1972_s7, %s1546_s6  ;;  %p1551_p7 = scmp.lt.u32.totalorder %s1972_s7, %s2059_s4 }
 0x367   : > { %p1552_p4 = scmp.lt.u32.totalorder %s1550_s8, %s1546_s6  ;;  %p1554_p0 = scmp.lt.u32.totalorder %s1546_s6, %s1972_s7 }
 0x368   : > { %p1548_p2 = pnand %p1547_p11, %p2091_p10 }
 0x369   : > { %p1553_p3 = por %p1552_p4, %p1551_p7 }
 0x36a   : > { %p1549_p5 = pneg %p1548_p2 }
 0x36b   : > { %p1555_p8 = por %p1554_p0, %p1553_p3 }
 0x36d   : > { %p1556_p9 = pnand %p1555_p8, %p1549_p5 }
 0x36f   : > { %1559 = shalt.err (!%p1556_p9)
}
 0x370   : > { %s1660_s24 = smov 128   ;;  %s1661_s13 = smov 8   ;;  %v858_v63 = vpop.f32.mrb[4].mxu1  ;;  %v931_v0 = vpop.f32.mrb[6].mxu0  ;;  %vm1021_vm3 = vcmask 523264   ;;  %vm1023_vm4 = vcmask 785408  }
 0x371   : > { %1347 = dma.vmem_to_hbm [thread:$0]  (%p2091_p10), %s1974_s29, 512, %s1972_s7, %s1036_s11, %s1660_s24, %s1660_s24, %s1661_s13   ;;  %v1329_v1 = vpop.f32.mrb[5].mxu1  ;;  %v1334_v2 = vpop.f32.mrb[7].mxu0 }
 0x372   : > { %s1662_s21 = smov 32   ;;  %s1663_s27 = smov 64   ;;  %v1004_v3 = vpop.f32.mrb[6].mxu1 }
 0x373   : > { %1009 = vrot.lane.b32.xlu0 %v858_v63, %s1662_s21  ;;  %1013 = vrot.lane.b32.xlu1 %v931_v0, %s1663_s27  ;;  %v1339_v4 = vpop.f32.mrb[7].mxu1  ;;  %s1664_s19 = smov 96   ;;  %s1259_s9 = sshll.u32 %s1901_s25, 3 }
 0x374   : > { %s1275_s29 = sshll.u32 %s1642_s18, 7  ;;  %s338_s5 = scalar_lea.vmem [#allocation8], %s1259_s9 }
 0x375   : > { %s1051_s7 = sshll.u32 %s338_s5, 4  ;;  %s2006_s20 = scalar_lea.hbm %s2058_s3, %s1275_s29  ;;  %s2008_s7 = int_to_ptr.vmem [resolvable:$true] %s1051_s7 }
 0x376   : > { %s1031_s1 = scalar_lea.sflag [#allocation4], %s1901_s25  ;;  %s1560_s23 = scalar_lea.vmem %s2008_s7, 128 }
 0x377   : > { %1017 = vrot.lane.b32.xlu1 %v1004_v3, %s1664_s19  ;;  %p1561_p12 = scmp.ne.s32.totalorder %s2008_s7, %s1560_s23  ;;  %s1665_s18 = smov [#allocation8]  }
 0x378   : > { %s1564_s6 = sshll.u32 %s1665_s18, 4  ;;  %s1565_s6 = int_to_ptr.vmem [resolvable:$false] %s1564_s6 }
 0x379   : > { %p1562_p1 = pnand %p1561_p12, %p2091_p10  ;;  %s1566_s10 = scalar_lea.vmem %s1565_s6, 256 }
 0x37a   : > { %p1567_p13 = scmp.lt.s32.totalorder %s2008_s7, %s1565_s6  ;;  %p1568_p11 = scmp.lt.s32.totalorder %s1566_s10, %s1560_s23 }
 0x37b   : > { %p1563_p6 = pneg %p1562_p1 }
 0x37c   : > { %p1569_p2 = por %p1568_p11, %p1567_p13 }
 0x37e   : > { %p1570_p5 = pnand %p1569_p2, %p1563_p6 }
 0x3e5   : > { %v1010_v5 = vpop.permute.xlu0 %1009  ;;  %v1014_v6 = vpop.permute.xlu1 %1013 }
 0x3e6   : > { %v1020_v7 = vsel %vm366_vm1, %v785_v61, %v1010_v5 }
 0x3e7   : > { %v1022_v8 = vsel %vm1021_vm3, %v1020_v7, %v1014_v6 }
 0x3e9   : > { %v1018_v9 = vpop.permute.xlu1 %1017 }
 0x3ea   : > { %v1024_v10 = vsel %vm1023_vm4, %v1022_v8, %v1018_v9 }
 0x3eb   : > { %1025 = vst [vmem:[%s338_s5] sm:$0xff] %v1024_v10 }
 0x3ec   : > { %1573 = shalt.err (!%p1570_p5)
}
 0x3ed   : > { %s1574_s25 = scalar_lea.hbm %s2006_s20, 128  ;;  %s1578_s26 = scalar_lea.hbm %s2058_s3, 256 }
 0x3ee   : > { %p1575_p7 = scmp.ne.s32.totalorder %s2006_s20, %s1574_s25  ;;  %p1579_p0 = scmp.lt.u32.totalorder %s2006_s20, %s2058_s3 }
 0x3ef   : > { %p1580_p8 = scmp.lt.u32.totalorder %s1578_s26, %s1574_s25  ;;  %p1582_p12 = scmp.lt.u32.totalorder %s1574_s25, %s2006_s20 }
 0x3f0   : > { %p1576_p4 = pnand %p1575_p7, %p2091_p10 }
 0x3f1   : > { %p1581_p9 = por %p1580_p8, %p1579_p0 }
 0x3f2   : > { %p1577_p3 = pneg %p1576_p4 }
 0x3f3   : > { %p1583_p1 = por %p1582_p12, %p1581_p9 }
 0x3f5   : > { %p1584_p6 = pnand %p1583_p1, %p1577_p3 }
 0x3f7   : > { %1587 = shalt.err (!%p1584_p6)
}
 0x3f8   : > { %1346 = dma.vmem_to_hbm [thread:$0]  (%p2091_p10), %s2008_s7, 128, %s2006_s20, %s1031_s1  }
 0x3f9 PF: > { %s2092_s13 = sld [smem:[#allocation16_spill]]  ;;  %s1082_s21 = sand.u32 1, %s1630_s15  }
 0x3fa   : > { %p2093_p13 = scmp.ne.s32.totalorder %s2079_s30, 0  ;;  %s1083_s27 = scalar_lea.sflag [#allocation4], %s1082_s21 }
 0x3ff   : > { %p2094_p11 = scmp.ge.s32.totalorder %s2092_s13, 2 }
 0x401   : > { %p1361_p2 = pnand %p2094_p11, %p2093_p13 }
 0x403   : > { %1621 = dma.done.wait (!%p1361_p2), %s1083_s27, 128  }
 0x404   : > { %1623 = vsyncadd (!%p1361_p2), %s1083_s27, 4294967168  ;;  %s1092_s19 = scalar_lea.sflag [#allocation10], %s1082_s21 }
 0x405   : > { %1625 = dma.done.wait (!%p1361_p2), %s1092_s19, 512  }
 0x406   : > { %1627 = vsyncadd (!%p1361_p2), %s1092_s19, 4294966784  ;;  %s27_s20 = sadd.s32 1, %s2092_s13   ;;  %s2095_s28 = sld [smem:[#allocation18_spill]] }
 0x407   : > { %p24_p5 = scmp.ge.s32.totalorder %s27_s20, 4   ;;  %s2096_s18 = sld [smem:[#allocation15_spill]] }
 0x408   : > { %s2097_s19 = sld [smem:[#allocation17_spill]]  ;;  %s2098_s15 = smov %s1634_s16 }
 0x409   : > { %s2099_s16 = smov %s1638_s17  ;;  %26 = sbr.rel (!%p24_p5) target bundleno = 12 (0xc), region = 118 }
 0x40c   : > { %s2100_s17 = smov %s2095_s28 }
 0x410   :  { %1097 = vsyncpa [#allocation3], 1 }
 0x411   :  { %1099 = vsyncpa [#allocation3 + $0x1], 1 }
 0x412   :  { %1100 = vsyncpa [#allocation6], 1 }
 0x413   :  { %1102 = vsyncpa [#allocation6 + $0x1], 1 }
 0x414   :  { %1103 = vsyncpa [#allocation4], 1 }
 0x415   :  { %1105 = vsyncpa [#allocation4 + $0x1], 1 }
 0x416   :  { %1106 = vsyncpa [#allocation10], 1 }
 0x417   :  { %1108 = vsyncpa [#allocation10 + $0x1], 1 }

</bundles_post_ra>
